<compile_context>
chip_gen: v7x
topology: tpu7x:2x2x1
jax: 0.10.0
libtpu: 0.0.40
codegen_flags: <defaults>
</compile_context>

<pallas_src>
import functools

import jax
import jax.numpy as jnp
from jax.experimental import pallas as pl
from jax.experimental.pallas import tpu as pltpu


def _group_norm_kernel(x_ref, w_ref, b_ref, o_ref, *, eps: float):
    """One (batch-block, group-block) tile per grid step.

    x_ref : (NB, GB, cs, HW)   input tile (free NCHW reshape; HW is lane axis)
    w_ref : (1, GB, cs, 1)     per-channel affine weight for these groups
    b_ref : (1, GB, cs, 1)     per-channel affine bias   for these groups
    o_ref : (NB, GB, cs, HW)   output tile (same layout -> lane-dense stores)
    """
    _, _, cs, hw = x_ref.shape
    n = cs * hw

    x = x_ref[...].astype(jnp.float32)

    # Per-(image, group) statistics: reduce lane axis (HW) then sublane axis (cs).
    s = jnp.sum(x, axis=3, keepdims=True)
    s = jnp.sum(s, axis=2, keepdims=True)                   # (NB, GB, 1, 1)
    mean = s * (1.0 / n)

    d = x - mean
    ss = jnp.sum(d * d, axis=3, keepdims=True)
    ss = jnp.sum(ss, axis=2, keepdims=True)                 # (NB, GB, 1, 1)
    var = ss * (1.0 / max(n - 1, 1))                        # unbiased: torch.var default
    inv = jax.lax.rsqrt(var + eps)

    # Fold inv-std into the tiny per-channel scale before touching the big tensor.
    scale = inv * w_ref[...]                                 # (NB, GB, cs, 1)
    o_ref[...] = (d * scale + b_ref[...]).astype(o_ref.dtype)


def _pick_blocks(N, G, per_group_bytes, budget=4 << 20):
    """Choose (batch_block, group_block) so one input tile is ~<= budget bytes."""
    per_image = G * per_group_bytes
    if per_image <= budget:
        # Whole image(s) per step; block over batch.
        gb = G
        nb = max(1, min(N, budget // max(per_image, 1)))
        while nb > 1 and (N % nb != 0 or (N // nb) < 2):
            nb -= 1
        return nb, gb
    # Single image too big: one image per step, block over groups.
    gb = max(1, min(G, budget // max(per_group_bytes, 1)))
    while gb > 1 and G % gb != 0:
        gb -= 1
    return 1, gb


def group_norm_forward(x_nchw, weight=None, bias=None, *, num_groups,
                       eps=1e-5, block_batch=None, block_groups=None):
    """GroupNorm forward.  x_nchw: (N, C, H, W); weight/bias: (1,C,1,1) or (C,)."""
    N, C, H, W = x_nchw.shape
    G = num_groups
    assert C % G == 0, "num_channels must be divisible by num_groups"
    cs = C // G
    HW = H * W

    if weight is None:
        weight = jnp.ones((C,), jnp.float32)
    if bias is None:
        bias = jnp.zeros((C,), jnp.float32)
    w = jnp.asarray(weight, jnp.float32).reshape(1, G, cs, 1)
    b = jnp.asarray(bias, jnp.float32).reshape(1, G, cs, 1)

    # Free contiguous view: channels of a group + spatial dims stay contiguous,
    # so no transpose / extra HBM pass is needed.
    x4 = x_nchw.reshape(N, G, cs, HW)

    per_group_bytes = cs * HW * x_nchw.dtype.itemsize
    auto_nb, auto_gb = _pick_blocks(N, G, per_group_bytes)
    NB = block_batch if block_batch is not None else auto_nb
    GB = block_groups if block_groups is not None else auto_gb
    assert N % NB == 0 and G % GB == 0

    kernel = functools.partial(_group_norm_kernel, eps=eps)
    out = pl.pallas_call(
        kernel,
        out_shape=jax.ShapeDtypeStruct((N, G, cs, HW), x_nchw.dtype),
        grid_spec=pltpu.PrefetchScalarGridSpec(
            num_scalar_prefetch=0,
            grid=(N // NB, G // GB),
            in_specs=[
                pl.BlockSpec((NB, GB, cs, HW), lambda n, g: (n, g, 0, 0)),
                pl.BlockSpec((1, GB, cs, 1), lambda n, g: (0, g, 0, 0)),
                pl.BlockSpec((1, GB, cs, 1), lambda n, g: (0, g, 0, 0)),
            ],
            out_specs=pl.BlockSpec((NB, GB, cs, HW), lambda n, g: (n, g, 0, 0)),
        ),
        compiler_params=pltpu.CompilerParams(
            dimension_semantics=("parallel", "parallel")),
    )(x4, w, b)

    return out.reshape(N, C, H, W)


def reference_group_norm(x, weight, bias, *, num_groups, eps=1e-5):
    """Pure-JAX reference mirroring the PyTorch module (torch.var -> unbiased)."""
    N, C, H, W = x.shape
    G = num_groups
    xg = x.reshape(N, G, -1).astype(jnp.float32)
    mean = xg.mean(axis=-1, keepdims=True)
    var = xg.var(axis=-1, ddof=1, keepdims=True)
    xg = (xg - mean) / jnp.sqrt(var + eps)
    y = xg.reshape(N, C, H, W)
    y = y * weight.reshape(1, C, 1, 1) + bias.reshape(1, C, 1, 1)
    return y.astype(x.dtype)


if __name__ == "__main__":
    N, C, H, W = 2, 4, 16, 16
    NUM_GROUPS = 2
    EPS = 1e-5

    key = jax.random.PRNGKey(0)
    kx, kw, kb = jax.random.split(key, 3)
    x = jax.random.normal(kx, (N, C, H, W), dtype=jnp.float32)

    # Module-init parameters (reset_parameters): weight = ones, bias = zeros.
    w_init = jnp.ones((1, C, 1, 1), jnp.float32)
    b_init = jnp.zeros((1, C, 1, 1), jnp.float32)

    out = jax.block_until_ready(
        group_norm_forward(x, w_init, b_init, num_groups=NUM_GROUPS, eps=EPS))
    ref = reference_group_norm(x, w_init, b_init, num_groups=NUM_GROUPS, eps=EPS)
    assert out.shape == (N, C, H, W)
    assert jnp.allclose(out, ref, atol=1e-4, rtol=1e-4), "mismatch (init affine)"

    # Non-trivial affine params to exercise the scale/shift path.
    w_rand = 1.0 + 0.1 * jax.random.normal(kw, (1, C, 1, 1), dtype=jnp.float32)
    b_rand = 0.1 * jax.random.normal(kb, (1, C, 1, 1), dtype=jnp.float32)
    out2 = jax.block_until_ready(
        group_norm_forward(x, w_rand, b_rand, num_groups=NUM_GROUPS, eps=EPS))
    ref2 = reference_group_norm(x, w_rand, b_rand, num_groups=NUM_GROUPS, eps=EPS)
    assert jnp.allclose(out2, ref2, atol=1e-4, rtol=1e-4), "mismatch (random affine)"

    print("KERNEL_OK")
</pallas_src>

<mosaic_0001>
module attributes {stable_mosaic.version = 11 : i64} {
  func.func @_group_norm_kernel(%arg0: i32, %arg1: i32, %arg2: memref<1x2x2x256xf32, #tpu.memory_space<vmem>>, %arg3: memref<1x2x2x1xf32, #tpu.memory_space<vmem>>, %arg4: memref<1x2x2x1xf32, #tpu.memory_space<vmem>>, %arg5: memref<1x2x2x256xf32, #tpu.memory_space<vmem>>) attributes {dimension_semantics = [#tpu.dimension_semantics<parallel>, #tpu.dimension_semantics<parallel>], iteration_bounds = array<i64: 2, 1>, scalar_prefetch = 0 : i64, scratch_operands = 0 : i64, tpu.core_type = #tpu.core_type<tc>, window_params = [{transform_indices = @transform_0, window_bounds = array<i64: 1, 2, 2, 256>}, {transform_indices = @transform_1, window_bounds = array<i64: 1, 2, 2, 1>}, {transform_indices = @transform_2, window_bounds = array<i64: 1, 2, 2, 1>}, {transform_indices = @transform_3, window_bounds = array<i64: 1, 2, 2, 256>}]} {
    %c0 = arith.constant 0 : index
    %c0_0 = arith.constant 0 : index
    %c0_1 = arith.constant 0 : index
    %c0_2 = arith.constant 0 : index
    %0 = vector.load %arg2[%c0, %c0_0, %c0_1, %c0_2] : memref<1x2x2x256xf32, #tpu.memory_space<vmem>>, vector<1x2x2x256xf32>
    %cst = arith.constant dense<0.000000e+00> : vector<1x2x2xf32>
    %1 = vector.multi_reduction <add>, %0, %cst [3] : vector<1x2x2x256xf32> to vector<1x2x2xf32>
    %2 = vector.shape_cast %1 : vector<1x2x2xf32> to vector<1x2x2x1xf32>
    %cst_3 = arith.constant dense<0.000000e+00> : vector<1x2x1xf32>
    %3 = vector.multi_reduction <add>, %2, %cst_3 [2] : vector<1x2x2x1xf32> to vector<1x2x1xf32>
    %4 = vector.shape_cast %3 : vector<1x2x1xf32> to vector<1x2x1x1xf32>
    %cst_4 = arith.constant 0.001953125 : f32
    %5 = vector.broadcast %cst_4 : f32 to vector<1x2x1x1xf32>
    %6 = arith.mulf %4, %5 : vector<1x2x1x1xf32>
    %7 = vector.broadcast %6 : vector<1x2x1x1xf32> to vector<1x2x2x256xf32>
    %8 = arith.subf %0, %7 : vector<1x2x2x256xf32>
    %9 = arith.mulf %8, %8 : vector<1x2x2x256xf32>
    %cst_5 = arith.constant dense<0.000000e+00> : vector<1x2x2xf32>
    %10 = vector.multi_reduction <add>, %9, %cst_5 [3] : vector<1x2x2x256xf32> to vector<1x2x2xf32>
    %11 = vector.shape_cast %10 : vector<1x2x2xf32> to vector<1x2x2x1xf32>
    %cst_6 = arith.constant dense<0.000000e+00> : vector<1x2x1xf32>
    %12 = vector.multi_reduction <add>, %11, %cst_6 [2] : vector<1x2x2x1xf32> to vector<1x2x1xf32>
    %13 = vector.shape_cast %12 : vector<1x2x1xf32> to vector<1x2x1x1xf32>
    %cst_7 = arith.constant 0.00195694715 : f32
    %14 = vector.broadcast %cst_7 : f32 to vector<1x2x1x1xf32>
    %15 = arith.mulf %13, %14 : vector<1x2x1x1xf32>
    %cst_8 = arith.constant 9.99999974E-6 : f32
    %16 = vector.broadcast %cst_8 : f32 to vector<1x2x1x1xf32>
    %17 = arith.addf %15, %16 : vector<1x2x1x1xf32>
    %18 = math.rsqrt %17 : vector<1x2x1x1xf32>
    %c0_9 = arith.constant 0 : index
    %c0_10 = arith.constant 0 : index
    %c0_11 = arith.constant 0 : index
    %c0_12 = arith.constant 0 : index
    %19 = vector.load %arg3[%c0_9, %c0_10, %c0_11, %c0_12] : memref<1x2x2x1xf32, #tpu.memory_space<vmem>>, vector<1x2x2x1xf32>
    %20 = vector.broadcast %18 : vector<1x2x1x1xf32> to vector<1x2x2x1xf32>
    %21 = arith.mulf %20, %19 : vector<1x2x2x1xf32>
    %22 = vector.broadcast %21 : vector<1x2x2x1xf32> to vector<1x2x2x256xf32>
    %23 = arith.mulf %8, %22 : vector<1x2x2x256xf32>
    %c0_13 = arith.constant 0 : index
    %c0_14 = arith.constant 0 : index
    %c0_15 = arith.constant 0 : index
    %c0_16 = arith.constant 0 : index
    %24 = vector.load %arg4[%c0_13, %c0_14, %c0_15, %c0_16] : memref<1x2x2x1xf32, #tpu.memory_space<vmem>>, vector<1x2x2x1xf32>
    %25 = vector.broadcast %24 : vector<1x2x2x1xf32> to vector<1x2x2x256xf32>
    %26 = arith.addf %23, %25 : vector<1x2x2x256xf32>
    %c0_17 = arith.constant 0 : index
    %c0_18 = arith.constant 0 : index
    %c0_19 = arith.constant 0 : index
    %c0_20 = arith.constant 0 : index
    %27 = vector.load %arg5[%c0_17, %c0_18, %c0_19, %c0_20] : memref<1x2x2x256xf32, #tpu.memory_space<vmem>>, vector<1x2x2x256xf32>
    tpu.vector_store %arg5[%c0_17, %c0_18, %c0_19, %c0_20], %26 {strides = array<i32>} : memref<1x2x2x256xf32, #tpu.memory_space<vmem>>, vector<1x2x2x256xf32>,
    return
  }
  func.func @transform_0(%arg0: i32, %arg1: i32) -> (i32, i32, i32, i32) {
    %c0_i32 = arith.constant 0 : i32
    %c0_i32_0 = arith.constant 0 : i32
    %c0_i32_1 = arith.constant 0 : i32
    return %arg0, %arg1, %c0_i32, %c0_i32_0 : i32, i32, i32, i32
  }
  func.func @transform_1(%arg0: i32, %arg1: i32) -> (i32, i32, i32, i32) {
    %c0_i32 = arith.constant 0 : i32
    %c0_i32_0 = arith.constant 0 : i32
    %c0_i32_1 = arith.constant 0 : i32
    %c0_i32_2 = arith.constant 0 : i32
    return %c0_i32, %arg1, %c0_i32_0, %c0_i32_1 : i32, i32, i32, i32
  }
  func.func @transform_2(%arg0: i32, %arg1: i32) -> (i32, i32, i32, i32) {
    %c0_i32 = arith.constant 0 : i32
    %c0_i32_0 = arith.constant 0 : i32
    %c0_i32_1 = arith.constant 0 : i32
    %c0_i32_2 = arith.constant 0 : i32
    return %c0_i32, %arg1, %c0_i32_0, %c0_i32_1 : i32, i32, i32, i32
  }
  func.func @transform_3(%arg0: i32, %arg1: i32) -> (i32, i32, i32, i32) {
    %c0_i32 = arith.constant 0 : i32
    %c0_i32_0 = arith.constant 0 : i32
    %c0_i32_1 = arith.constant 0 : i32
    return %arg0, %arg1, %c0_i32, %c0_i32_0 : i32, i32, i32, i32
  }
}

</mosaic_0001>

<bundles_post_ra>
// kernel: tpu_custom_call.1
= control target key start
LH: loop header
LB: loop body
LE: loop exit
PB: predicated region body
PF: predicated region fallthrough
CT: control target
= control target key end

     0   :  { %8 = vsyncpa [#allocation3], 0  ;;  %s1004_s0 = inlined_call_operand.hbm [shape: f32[2,2,2,256], index: 0, kind: input, shape index: {}]   ;;  %s1005_s1 = inlined_call_operand.vmem [shape: f32[1,2,2,1], index: 1, kind: input, shape index: {}]   ;;  %s1006_s2 = inlined_call_operand.vmem [shape: f32[1,2,2,1], index: 2, kind: input, shape index: {}]   ;;  %s1007_s3 = inlined_call_operand.hbm [shape: f32[2,2,2,256], index: 3, kind: output, shape index: {}]  }
   0x1   :  { %10 = vsyncpa [#allocation3 + $0x1], 0 }
   0x2   :  { %11 = vsyncpa [#allocation4], 0 }
   0x3   :  { %13 = vsyncpa [#allocation4 + $0x1], 0  ;;  %s792_s12 = smov 0   ;;  %s794_s13 = smov 0  }
   0x4   :  { %s796_s14 = smov 0   ;;  %s798_s15 = smov 0  }
   0x5   :  { %s800_s16 = smov 0   ;;  %s802_s17 = smov 0  }
   0x6 LB: > { %s555_s18 = sadd.s32 4294967295, %s761_s17   ;;  %s556_s19 = sadd.s32 4294967294, %s761_s17   ;;  %s761_s17 = sphi %s802_s17, %s19_s17   ;;  %s757_s16 = sphi %s800_s16, %s1022_s16   ;;  %s753_s15 = sphi %s798_s15, %s1021_s15   ;;  %s749_s14 = sphi %s796_s14, %s1020_s14   ;;  %s745_s13 = sphi %s794_s13, %s1019_s13   ;;  %s741_s12 = sphi %s792_s12, %s1018_s12  }
   0x7   : > { %s31_s20 = sadd.s32 1, %s757_s16  ;;  %s40_s21 = sadd.s32 1, %s749_s14 }
   0x8   : > { %p33_p0 = scmp.ge.s32.totalorder %s31_s20, 2  ;;  %p47_p1 = scmp.ne.s32.totalorder %s749_s14, %s745_s13 }
   0x9   : > { %p48_p2 = scmp.eq.s32.totalorder %s761_s17, 0  ;;  %p53_p3 = scmp.ne.s32.totalorder %s745_s13, %s741_s12 }
   0xa   : > { %s1024_s20 = smov (%p33_p0, %s31_s20), 0  ;;  %p54_p5 = scmp.eq.s32.totalorder %s555_s18, 0 }
   0xb   : > { %p833_p4 = por %p48_p2, %p47_p1  ;;  %s35_s23 = ssub.s32 %s757_s16, %s1024_s20 }
   0xc   : > { %p131_p6 = scmp.eq.s32.totalorder %s555_s18, 1  ;;  %p38_p7 = scmp.eq.s32.totalorder %s35_s23, 0 }
   0xd   : > { %p839_p8 = por %p54_p5, %p53_p3  ;;  %p137_p10 = scmp.eq.s32.totalorder %s556_s19, 1 }
   0xe   : > { %p843_p9 = por %p131_p6, %p47_p1  ;;  %p586_p13 = scmp.lt.s32.totalorder %s761_s17, 2 }
   0xf   : > { %s848_s26 = scalar_select %p38_p7, %s749_s14, %s40_s21  }
  0x10   : > { %s1011_s25 = scalar_select %p843_p9, 1, 0 }
  0x11   : > { %p850_p11 = por %p137_p10, %p53_p3  ;;  %s175_s28 = sand.u32 1, %s749_s14  }
  0x12   : > { %s561_s29 = sshll.u32 %s175_s28, 3  ;;  %s572_s30 = sshll.u32 %s757_s16, 7 }
  0x13   : > { %s1012_s27 = scalar_select %p850_p11, 1, 0 }
  0x14   : > { %s861_s6 = scalar_lea.hbm %s1004_s0, %s572_s30  ;;  %s179_s7 = scalar_lea.vmem [#allocation2], %s561_s29 }
  0x15   : > { %s189_s8 = sshll.u32 %s179_s7, 4  ;;  %p867_p0 = pnand %p586_p13, %p833_p4  ;;  %s863_s8 = int_to_ptr.vmem [resolvable:$true] %s189_s8 }
  0x16   : > { %s872_s10 = scalar_lea.sflag [#allocation3], %s175_s28  ;;  %s649_s11 = scalar_lea.hbm %s861_s6, 128 }
  0x17   : > { %p650_p2 = scmp.ne.s32.totalorder %s861_s6, %s649_s11  ;;  %p651_p3 = pneg %p867_p0 }
  0x18   : > { %s654_s21 = scalar_lea.hbm %s1004_s0, 256  ;;  %p655_p4 = scmp.lt.u32.totalorder %s861_s6, %s1004_s0 }
  0x19   : > { %p652_p5 = pnand %p651_p3, %p650_p2  ;;  %p656_p7 = scmp.lt.u32.totalorder %s654_s21, %s649_s11 }
  0x1a   : > { %p658_p13 = scmp.lt.u32.totalorder %s649_s11, %s861_s6 }
  0x1b   : > { %p653_p6 = pneg %p652_p5  ;;  %p657_p10 = por %p656_p7, %p655_p4 }
  0x1d   : > { %p659_p12 = por %p658_p13, %p657_p10 }
  0x1f   : > { %p660_p1 = pnand %p659_p12, %p653_p6 }
  0x21   : > { %663 = shalt.err (!%p660_p1)
}
  0x22   : > { %s664_s28 = scalar_lea.vmem %s863_s8, 128  ;;  %s763_s29 = smov [#allocation2]  }
  0x23   : > { %p665_p2 = scmp.ne.s32.totalorder %s863_s8, %s664_s28  ;;  %s669_s30 = sshll.u32 %s763_s29, 4  ;;  %s670_s30 = int_to_ptr.vmem [resolvable:$false] %s669_s30 }
  0x24   : > { %s671_s4 = scalar_lea.vmem %s670_s30, 256  ;;  %p672_p9 = scmp.lt.s32.totalorder %s863_s8, %s670_s30 }
  0x25   : > { %p667_p5 = pnand %p665_p2, %p651_p3  ;;  %p673_p4 = scmp.lt.s32.totalorder %s671_s4, %s664_s28 }
  0x27   : > { %p668_p11 = pneg %p667_p5  ;;  %p674_p7 = por %p673_p4, %p672_p9 }
  0x29   : > { %p675_p10 = pnand %p674_p7, %p668_p11 }
  0x2b   : > { %678 = shalt.err (!%p675_p10)
}
  0x2c   : > { %s764_s5 = smov 64   ;;  %s765_s7 = smov 4  }
  0x2d   : > { %581 = dma.hbm_to_vmem [thread:$0]  (!%p867_p0), %s861_s6, 128, %s863_s8, %s872_s10, %s764_s5, %s764_s5, %s765_s7  }
  0x2e   : > { %p197_p12 = scmp.lt.s32.totalorder %s761_s17, 3  ;;  %p1014_p1 = scmp.ge.s32.totalorder %s761_s17, 1 }
  0x30   : > { %p198_p3 = pnand %p1014_p1, %p197_p12 }
  0x31   : > { %s904_s11 = sand.u32 (!%p198_p3), 1, %s745_s13  }
  0x32   : > { %201 = sbr.rel (%p198_p3) target bundleno = 567 (0x237), region = 32  ;;  %s565_s18 = sshll.u32 (!%p198_p3), %s904_s11, 3 }
  0x33   : > { %s204_s19 = scalar_lea.sflag (!%p198_p3), [#allocation3], %s904_s11  ;;  %s207_s21 = scalar_lea.vmem (!%p198_p3), [#allocation2], %s565_s18 }
  0x39   : > { %732 = dma.done.wait (%p839_p8), %s204_s19, 128  }
  0x3a   : > { %734 = vsyncadd (%p839_p8), %s204_s19, 4294967168  ;;  %v261_v0 = vlaneseq  ;;  %v766_v1 = vmov 1983009808   ;;  %v254_v6 = vld [vmem:[%s207_s21] sm:$0xf]  ;;  %vm278_vm0 = vcmask 1041408  }
  0x3b   : > { %v259_v2 = vunpack.c.l.s4 %v766_v1  ;;  %v255_v7 = vld [vmem:[%s207_s21 + $0x4] sm:$0xf]  ;;  %v767_v50 = vmov 0   ;;  %v391_v51 = vld [vmem:[%s1006_s2] sm:$0x3]  ;;  %s239_s29 = scalar_lea.vmem [#allocation5], %s565_s18 }
  0x3c   : > { %v914_v3 = vshrl.u32 %v261_v0, 7  ;;  %644 = vset.pattern.permute.xlu1 %v767_v50  ;;  %643 = vset.pattern.permute.xlu0 %v767_v50  ;;  %s438_s30 = sshll.u32 %s239_s29, 4  ;;  %s573_s4 = sshll.u32 %s753_s15, 7  ;;  %s949_s30 = int_to_ptr.vmem [resolvable:$true] %s438_s30 }
  0x3d   : > { %v260_v4 = vunpack.c.0.s8 %v259_v2  ;;  %s955_s19 = scalar_lea.hbm %s1007_s3, %s573_s4  ;;  %s422_s18 = scalar_lea.sflag [#allocation4], %s904_s11 }
  0x3e   : > { %s679_s21 = scalar_lea.vmem %s949_s30, 128  ;;  %p1015_p9 = scmp.ne.s32.totalorder %s1011_s25, 0 }
  0x3f   : > { %v263_v5 = vsub.s32 %v260_v4, %v914_v3  ;;  %p680_p8 = scmp.ne.s32.totalorder %s949_s30, %s679_s21  ;;  %s769_s15 = smov [#allocation5]  }
  0x40   : > { %s683_s24 = sshll.u32 %s769_s15, 4  ;;  %s684_s24 = int_to_ptr.vmem [resolvable:$false] %s683_s24 }
  0x41   : > { %v264_v8 = vrot.slane %v254_v6, %v263_v5  ;;  %v272_v9 = vrot.slane %v255_v7, %v263_v5  ;;  %p681_p11 = pnand %p680_p8, %p1015_p9  ;;  %s685_s6 = scalar_lea.vmem %s684_s24, 256 }
  0x42   : > { %p686_p6 = scmp.lt.s32.totalorder %s949_s30, %s684_s24  ;;  %p687_p13 = scmp.lt.s32.totalorder %s685_s6, %s679_s21 }
  0x43   : > { %v265_v10 = vcombine.high %v264_v8, %v264_v8  ;;  %v279_v11 = vsel %vm278_vm0, %v264_v8, 0.0  ;;  %v273_v12 = vcombine.high %v272_v9, %v272_v9  ;;  %v284_v14 = vsel %vm278_vm0, %v272_v9, 0.0  ;;  %v361_v9 = vld [vmem:[%s1005_s1] sm:$0x3]  ;;  %p682_p0 = pneg %p681_p11 }
  0x44   : > { %p688_p2 = por %p687_p13, %p686_p6 }
  0x45   : > { %v280_v13 = vsel %vm278_vm0, %v265_v10, 0.0  ;;  %v285_v15 = vsel %vm278_vm0, %v273_v12, 0.0  ;;  %v362_v12 = vld [vmem:[%s1005_s1 + $0x2] sm:$0x3] }
  0x46   : > { %v281_v16 = vadd.f32 %v280_v13, %v279_v11  ;;  %v286_v17 = vadd.f32 %v285_v15, %v284_v14  ;;  %v392_v15 = vld [vmem:[%s1006_s2 + $0x2] sm:$0x3]  ;;  %p689_p5 = pnand %p688_p2, %p682_p0 }
  0x48   : > { %282 = vadd.xlane.f32.xlu0 %v281_v16  ;;  %v768_v16 = vmov 269488144  }
  0x4c   : > { %287 = vadd.xlane.f32.xlu0 %v286_v17  ;;  %v374_v17 = vunpack.c.l.s4 %v768_v16 }
  0xd5   : > { %v283_v18 = vpop.xlane.xlu0 %282 }
  0xd6   : > { %v289_v19 = vsel %vm278_vm0, %v283_v18, 0.0  ;;  %v375_v18 = vunpack.c.0.s8 %v374_v17 }
  0xd7   : > { %v290_v20 = vrot.slane %v289_v19, 4 }
  0xd9   : > { %v291_v21 = vadd.f32 %v290_v20, %v289_v19  ;;  %v288_v22 = vpop.xlane.xlu0 %287  ;;  %v378_v19 = vsub.s32 %v375_v18, %v914_v3 }
  0xda   : > { %v296_v23 = vsel %vm278_vm0, %v288_v22, 0.0 }
  0xdb   : > { %v292_v24 = vrot.slane %v291_v21, 2  ;;  %v297_v25 = vrot.slane %v296_v23, 4 }
  0xdd   : > { %v293_v26 = vadd.f32 %v292_v24, %v291_v21  ;;  %v298_v27 = vadd.f32 %v297_v25, %v296_v23 }
  0xdf   : > { %v294_v28 = vrot.slane %v293_v26, 1  ;;  %v299_v29 = vrot.slane %v298_v27, 2 }
  0xe1   : > { %v295_v30 = vadd.f32 %v294_v28, %v293_v26  ;;  %v300_v31 = vadd.f32 %v299_v29, %v298_v27 }
  0xe3   : > { %v303_v32 = vmul.f32 0.001953125, %v295_v30  ;;  %v301_v33 = vrot.slane %v300_v31, 1 }
  0xe5   : > { %v302_v34 = vadd.f32 %v301_v33, %v300_v31  ;;  %v305_v35 = vsub.f32 %v254_v6, %v303_v32 }
  0xe7   : > { %v304_v36 = vmul.f32 0.001953125, %v302_v34  ;;  %v307_v37 = vmul.f32 %v305_v35, %v305_v35 }
  0xe9   : > { %v923_v38 = vsub.f32 %v255_v7, %v304_v36  ;;  %v317_v39 = vrot.slane %v307_v37, %v263_v5 }
  0xeb   : > { %v318_v40 = vcombine.high %v317_v39, %v317_v39  ;;  %v308_v41 = vmul.f32 %v923_v38, %v923_v38  ;;  %v331_v42 = vsel %vm278_vm0, %v317_v39, 0.0 }
  0xed   : > { %v332_v43 = vsel %vm278_vm0, %v318_v40, 0.0  ;;  %v325_v44 = vrot.slane %v308_v41, %v263_v5 }
  0xee   : > { %v333_v45 = vadd.f32 %v332_v43, %v331_v42 }
  0xef   : > { %v326_v46 = vcombine.high %v325_v44, %v325_v44  ;;  %v336_v47 = vsel %vm278_vm0, %v325_v44, 0.0 }
  0xf0   : > { %334 = vadd.xlane.f32.xlu1 %v333_v45 }
  0xf1   : > { %v337_v48 = vsel %vm278_vm0, %v326_v46, 0.0 }
  0xf2   : > { %v338_v49 = vadd.f32 %v337_v48, %v336_v47 }
  0xf4   : > { %339 = vadd.xlane.f32.xlu1 %v338_v49 }
 0x105   : > { %395 = vperm.xlu1 %644, %v391_v51  }
 0x17d   : > { %v335_v52 = vpop.xlane.xlu1 %334 }
 0x17e   : > { %v341_v53 = vsel %vm278_vm0, %v335_v52, 0.0 }
 0x17f   : > { %v342_v54 = vrot.slane %v341_v53, 4 }
 0x181   : > { %v343_v55 = vadd.f32 %v342_v54, %v341_v53  ;;  %v340_v56 = vpop.xlane.xlu1 %339 }
 0x182   : > { %v348_v57 = vsel %vm278_vm0, %v340_v56, 0.0 }
 0x183   : > { %v344_v58 = vrot.slane %v343_v55, 2  ;;  %v349_v59 = vrot.slane %v348_v57, 4 }
 0x185   : > { %v345_v60 = vadd.f32 %v344_v58, %v343_v55  ;;  %v350_v61 = vadd.f32 %v349_v59, %v348_v57  ;;  %v396_v20 = vpop.permute.xlu1 %395 }
 0x186   : > { %v407_v23 = vrot.slane %v396_v20, %v378_v19 }
 0x187   : > { %v346_v62 = vrot.slane %v345_v60, 1  ;;  %v351_v63 = vrot.slane %v350_v61, 2 }
 0x189   : > { %v347_v0 = vadd.f32 %v346_v62, %v345_v60  ;;  %v352_v1 = vadd.f32 %v351_v63, %v350_v61 }
 0x18b   : > { %v355_v2 = vmul.f32 0.0019569471, %v347_v0  ;;  %v353_v4 = vrot.slane %v352_v1, 1 }
 0x18d   : > { %v357_v5 = vadd.f32 1e-05, %v355_v2  ;;  %v354_v6 = vadd.f32 %v353_v4, %v352_v1 }
 0x18f   : > { %645 = vrsqrt.f32 %v357_v5  ;;  %v356_v7 = vmul.f32 0.0019569471, %v354_v6 }
 0x191   : > { %v358_v8 = vadd.f32 1e-05, %v356_v7 }
 0x193   : > { %647 = vrsqrt.f32 %v358_v8 }
 0x199   : > { %v646_v10 = vpop.eup %645 }
 0x19a   : > { %v363_v11 = vmul.f32 %v646_v10, %v361_v9 }
 0x19c   : > { %367 = vperm.xlu0 %643, %v363_v11  }
 0x19d   : > { %v648_v13 = vpop.eup %647 }
 0x19e   : > { %v364_v14 = vmul.f32 %v648_v13, %v362_v12 }
 0x1a0   : > { %371 = vperm.xlu1 %644, %v364_v14  }
 0x1a4   : > { %399 = vperm.xlu1 %644, %v392_v15  }
 0x21b   : > { %v368_v21 = vpop.permute.xlu0 %367 }
 0x21c   : > { %v379_v22 = vrot.slane %v368_v21, %v378_v19 }
 0x21e   : > { %v389_v24 = vmul.f32 %v379_v22, %v305_v35 }
 0x21f   : > { %v372_v25 = vpop.permute.xlu1 %371 }
 0x220   : > { %v417_v26 = vadd.f32 %v407_v23, %v389_v24  ;;  %v386_v27 = vrot.slane %v372_v25, %v378_v19 }
 0x222   : > { %419 = vst [vmem:[%s239_s29] sm:$0xf] %v417_v26  ;;  %v390_v3 = vmul.f32 %v386_v27, %v923_v38 }
 0x223   : > { %v400_v28 = vpop.permute.xlu1 %399 }
 0x224   : > { %v414_v29 = vrot.slane %v400_v28, %v378_v19 }
 0x226   : > { %v418_v30 = vadd.f32 %v414_v29, %v390_v3 }
 0x228   : > { %420 = vst [vmem:[%s239_s29 + $0x4] sm:$0xf] %v418_v30 }
 0x229   : > { %692 = shalt.err (!%p689_p5)
}
 0x22a   : > { %s693_s8 = scalar_lea.hbm %s955_s19, 128  ;;  %s697_s22 = scalar_lea.hbm %s1007_s3, 256 }
 0x22b   : > { %p694_p4 = scmp.ne.s32.totalorder %s955_s19, %s693_s8  ;;  %p698_p12 = scmp.lt.u32.totalorder %s955_s19, %s1007_s3 }
 0x22c   : > { %p699_p1 = scmp.lt.u32.totalorder %s697_s22, %s693_s8  ;;  %p701_p8 = scmp.lt.u32.totalorder %s693_s8, %s955_s19 }
 0x22d   : > { %p695_p7 = pnand %p694_p4, %p1015_p9 }
 0x22e   : > { %p700_p3 = por %p699_p1, %p698_p12 }
 0x22f   : > { %p696_p10 = pneg %p695_p7 }
 0x230   : > { %p702_p11 = por %p701_p8, %p700_p3 }
 0x232   : > { %p703_p0 = pnand %p702_p11, %p696_p10 }
 0x234   : > { %706 = shalt.err (!%p703_p0)
}
 0x235   : > { %s770_s29 = smov 64   ;;  %s771_s4 = smov 4  }
 0x236   : > { %576 = dma.vmem_to_hbm [thread:$0]  (%p1015_p9), %s949_s30, 128, %s955_s19, %s422_s18, %s770_s29, %s770_s29, %s771_s4  }
 0x237 PF: > { %s453_s5 = sand.u32 1, %s741_s12   ;;  %p1016_p6 = scmp.ne.s32.totalorder %s1012_s27, 0 }
 0x238   : > { %p1017_p13 = scmp.ge.s32.totalorder %s761_s17, 2  ;;  %s454_s7 = scalar_lea.sflag [#allocation4], %s453_s5 }
 0x23a   : > { %p583_p2 = pnand %p1017_p13, %p1016_p6 }
 0x23c   : > { %736 = dma.done.wait (!%p583_p2), %s454_s7, 128  }
 0x23d   : > { %738 = vsyncadd (!%p583_p2), %s454_s7, 4294967168  ;;  %s19_s17 = sadd.s32 1, %s761_s17   ;;  %s1018_s12 = smov %s745_s13 }
 0x23e   : > { %p16_p5 = scmp.ge.s32.totalorder %s19_s17, 4   ;;  %s1019_s13 = smov %s749_s14 }
 0x23f   : > { %s1020_s14 = smov %s848_s26  ;;  %s1021_s15 = smov %s757_s16 }
 0x240   : > { %s1022_s16 = smov %s1024_s20  ;;  %18 = sbr.rel (!%p16_p5) target bundleno = 6 (0x6), region = 83 }
 0x247   :  { %459 = vsyncpa [#allocation3], 1 }
 0x248   :  { %461 = vsyncpa [#allocation3 + $0x1], 1 }
 0x249   :  { %462 = vsyncpa [#allocation4], 1 }
 0x24a   :  { %464 = vsyncpa [#allocation4 + $0x1], 1 }

</bundles_post_ra>
